<compile_context>
chip_gen: v7x
topology: tpu7x:2x2x1
jax: 0.10.0
libtpu: 0.0.40
codegen_flags: <defaults>
</compile_context>

<pallas_src>
import functools
import math

import jax
import jax.numpy as jnp
import numpy as np
from jax import lax
from jax.experimental import pallas as pl
from jax.experimental.pallas import tpu as pltpu


def _cdiv(a, b):
    return -(-a // b)


def _round_up(a, b):
    return _cdiv(a, b) * b


def _vmem_capacity_bytes():
    try:
        return int(pltpu.get_tpu_info().vmem_capacity_bytes)
    except Exception:  # no TPU info available -> conservative v7x per-TC value
        return 64 << 20


def _ohem_ce_kernel(logits_ref, labels_ref, sum_ref, cnt_ref, *,
                    thresh, ignore_lb):
    """Per-tile cross-entropy + thresholded partial sum/count accumulation.

    logits_ref : (C, S, 128) native dtype    labels_ref : (S, 128) int32
    sum_ref    : (S, 128) f32 accumulator    cnt_ref    : (S, 128) f32 accumulator
    """
    t = pl.program_id(2)

    @pl.when(t == 0)
    def _():
        sum_ref[...] = jnp.zeros_like(sum_ref)
        cnt_ref[...] = jnp.zeros_like(cnt_ref)

    x = logits_ref[...].astype(jnp.float32)          # (C, S, 128), dense vregs
    lab = labels_ref[...]                            # (S, 128) int32

    # Numerically-stable log-softmax CE; class reduction = C-1 cross-vreg VPU ops.
    m = jnp.max(x, axis=0)                                        # (S, 128)
    lse = m + jnp.log(jnp.sum(jnp.exp(x - m), axis=0))            # (S, 128)
    cls = lax.broadcasted_iota(jnp.int32, x.shape, 0)
    picked = jnp.sum(jnp.where(cls == lab, x, 0.0), axis=0)       # (S, 128)
    valid = lab != ignore_lb
    loss = jnp.where(valid, lse - picked, 0.0)

    # OHEM statistics: per-element partial sum / count of losses above thresh.
    # `valid` gate keeps padded pixels out even if thresh_log <= 0.
    gt = jnp.logical_and(loss > thresh, valid).astype(jnp.float32)
    sum_ref[...] += loss * gt
    cnt_ref[...] += gt


def ohem_ce_loss(logits, labels, *, thresh, n_min, ignore_lb=255,
                 n_chunks=2, cast_to_bf16=False):
    """OhemCELoss.forward.  logits: (N, C, H, W), labels: (N, H, W) int."""
    N, C, H, W = logits.shape
    HW = H * W
    thresh_log = -math.log(float(thresh))

    if cast_to_bf16 and logits.dtype == jnp.float32:
        # Optional (v5e-focused): halves the dominant HBM read; the kernel
        # still upcasts and reduces in f32, but inputs are quantized to bf16.
        logits = logits.astype(jnp.bfloat16)

    dtype_bytes = jnp.dtype(logits.dtype).itemsize

    # --- tile sizing -------------------------------------------------------
    R = _cdiv(HW, 128)                                # rows of 128 pixels
    n_chunks_eff = max(1, min(int(n_chunks), _cdiv(R, 8)))

    vmem_cap = _vmem_capacity_bytes()
    # ~8-24 MiB of double-buffered input per step, per-generation capped.
    in_budget = min(24 << 20, max(8 << 20, vmem_cap // 4))
    per_row_bytes = 128 * (C * dtype_bytes + 4)       # logits row + labels row
    s_max = max(8, (in_budget // (2 * per_row_bytes)) // 8 * 8)
    s_need = _round_up(_cdiv(R, n_chunks_eff), 8)
    S = min(s_max, s_need)                            # sublane rows per tile

    tiles_per_chunk = _cdiv(R, n_chunks_eff * S)
    R_pad = n_chunks_eff * tiles_per_chunk * S        # no divisor constraint
    hw_pad = R_pad * 128

    # --- free reshape + padding with ignore_lb -----------------------------
    logits_flat = logits.reshape(N, C, HW)
    labels_flat = labels.reshape(N, HW).astype(jnp.int32)
    if hw_pad != HW:
        pad = hw_pad - HW
        logits_flat = jnp.pad(logits_flat, ((0, 0), (0, 0), (0, pad)))
        labels_flat = jnp.pad(labels_flat, ((0, 0), (0, pad)),
                              constant_values=ignore_lb)
    logits_r = logits_flat.reshape(N, C, R_pad, 128)
    labels_r = labels_flat.reshape(N, R_pad, 128)

    in_block = S * 128 * (C * dtype_bytes + 4)
    out_block = 2 * S * 128 * 4
    vmem_limit = int(min(vmem_cap - (2 << 20),
                         max(2 * in_block + 2 * out_block + (4 << 20),
                             32 << 20)))

    grid = (N, n_chunks_eff, tiles_per_chunk)

    sums, cnts = pl.pallas_call(
        functools.partial(_ohem_ce_kernel, thresh=thresh_log,
                          ignore_lb=ignore_lb),
        out_shape=(jax.ShapeDtypeStruct((N * n_chunks_eff, S, 128), jnp.float32),
                   jax.ShapeDtypeStruct((N * n_chunks_eff, S, 128), jnp.float32)),
        grid_spec=pltpu.PrefetchScalarGridSpec(
            num_scalar_prefetch=0,
            grid=grid,
            in_specs=[
                pl.BlockSpec((pl.Squeezed(), C, S, 128),
                             lambda n, c, t: (n, 0, c * tiles_per_chunk + t, 0)),
                pl.BlockSpec((pl.Squeezed(), S, 128),
                             lambda n, c, t: (n, c * tiles_per_chunk + t, 0)),
            ],
            out_specs=[
                pl.BlockSpec((pl.Squeezed(), S, 128),
                             lambda n, c, t: (n * n_chunks_eff + c, 0, 0)),
                pl.BlockSpec((pl.Squeezed(), S, 128),
                             lambda n, c, t: (n * n_chunks_eff + c, 0, 0)),
            ],
        ),
        compiler_params=pltpu.CompilerParams(
            dimension_semantics=("parallel", "parallel", "arbitrary"),
            vmem_limit_bytes=vmem_limit),
    )(logits_r, labels_r)

    # Tiny final reductions in JAX; count reduced exactly in int32.
    sum_gt = jnp.sum(sums)
    cnt_gt = jnp.sum(cnts.astype(jnp.int32))
    mean_gt = sum_gt / jnp.maximum(cnt_gt, 1).astype(jnp.float32)

    def _topk_mean():
        # Rare fallback (fewer than n_min losses above the threshold):
        # recompute per-pixel CE in plain JAX and take the top-n_min mean.
        # TODO(synk): sort / top-k has no Pallas TPU primitive; this branch is
        # gated behind lax.cond so the common path never pays for it.
        x = logits_flat.astype(jnp.float32)                   # (N, C, hw_pad)
        lab = labels_flat                                     # (N, hw_pad)
        lse = jax.nn.logsumexp(x, axis=1)                     # (N, hw_pad)
        safe = jnp.clip(lab, 0, C - 1)
        picked = jnp.take_along_axis(x, safe[:, None, :], axis=1)[:, 0, :]
        ce = jnp.where(lab == ignore_lb, 0.0, lse - picked).reshape(-1)
        topk, _ = lax.top_k(ce, n_min)
        return jnp.sum(topk) / float(n_min)

    # loss_sorted[n_min] > thresh  <=>  (# losses strictly > thresh) > n_min
    return lax.cond(cnt_gt > n_min, lambda: mean_gt, _topk_mean)


def _reference_ohem(logits, labels, thresh, n_min, ignore_lb):
    """Pure numpy re-implementation of the PyTorch module for validation."""
    logits = np.asarray(logits, dtype=np.float32)
    labels = np.asarray(labels)
    N, C, H, W = logits.shape
    x = np.transpose(logits, (0, 2, 3, 1)).reshape(-1, C)
    lab = labels.reshape(-1)
    m = x.max(axis=-1, keepdims=True)
    lse = m[:, 0] + np.log(np.exp(x - m).sum(axis=-1))
    safe_lab = np.clip(lab, 0, C - 1)
    ce = lse - x[np.arange(x.shape[0]), safe_lab]
    ce = np.where(lab == ignore_lb, 0.0, ce)
    t = -math.log(float(thresh))
    srt = np.sort(ce)[::-1]
    if srt[n_min] > t:
        kept = srt[srt > t]
    else:
        kept = srt[:n_min]
    return float(kept.mean())


if __name__ == "__main__":
    # OhemCELoss "parameters": thresh / n_min / ignore_lb set deterministically.
    thresh = 0.7
    n_min = 64
    ignore_lb = 255

    key = jax.random.PRNGKey(0)
    k1, k2, k3 = jax.random.split(key, 3)
    N, C, H, W = 2, 4, 16, 16
    logits = jax.random.normal(k1, (N, C, H, W), dtype=jnp.float32) * 2.0
    labels = jax.random.randint(k2, (N, H, W), 0, C, dtype=jnp.int32)
    # sprinkle some ignored pixels
    ignore_mask = jax.random.uniform(k3, (N, H, W)) < 0.1
    labels = jnp.where(ignore_mask, ignore_lb, labels)

    out = ohem_ce_loss(logits, labels, thresh=thresh, n_min=n_min,
                       ignore_lb=ignore_lb)
    out = jax.block_until_ready(out)

    ref = _reference_ohem(logits, labels, thresh, n_min, ignore_lb)
    assert abs(float(out) - ref) < 1e-4, (float(out), ref)
    print("KERNEL_OK")
</pallas_src>

<mosaic_0001>
module attributes {stable_mosaic.version = 11 : i64} {
  func.func @_ohem_ce_kernel(%arg0: i32, %arg1: i32, %arg2: i32, %arg3: memref<1x4x8x128xf32, #tpu.memory_space<vmem>>, %arg4: memref<1x8x128xi32, #tpu.memory_space<vmem>>, %arg5: memref<1x8x128xf32, #tpu.memory_space<vmem>>, %arg6: memref<1x8x128xf32, #tpu.memory_space<vmem>>) attributes {dimension_semantics = [#tpu.dimension_semantics<parallel>, #tpu.dimension_semantics<parallel>, #tpu.dimension_semantics<arbitrary>], iteration_bounds = array<i64: 2, 1, 1>, scalar_prefetch = 0 : i64, scratch_operands = 0 : i64, tpu.core_type = #tpu.core_type<tc>, window_params = [{transform_indices = @transform_0, window_bounds = array<i64: 1, 4, 8, 128>}, {transform_indices = @transform_1, window_bounds = array<i64: 1, 8, 128>}, {transform_indices = @transform_2, window_bounds = array<i64: 1, 8, 128>}, {transform_indices = @transform_3, window_bounds = array<i64: 1, 8, 128>}]} {
    %c0_i32 = arith.constant 0 : i32
    %0 = arith.cmpi eq, %arg2, %c0_i32 : i32
    %1 = arith.extui %0 : i1 to i32
    %c0_i32_0 = arith.constant 0 : i32
    %2 = arith.cmpi ne, %1, %c0_i32_0 : i32
    scf.if %2 {
      %cst_24 = arith.constant 0.000000e+00 : f32
      %45 = vector.broadcast %cst_24 : f32 to vector<8x128xf32>
      %c0_25 = arith.constant 0 : index
      %c0_26 = arith.constant 0 : index
      %c0_27 = arith.constant 0 : index
      %46 = vector.load %arg5[%c0_25, %c0_26, %c0_27] : memref<1x8x128xf32, #tpu.memory_space<vmem>>, vector<1x8x128xf32>
      %47 = vector.shape_cast %46 : vector<1x8x128xf32> to vector<8x128xf32>
      %48 = vector.shape_cast %45 : vector<8x128xf32> to vector<1x8x128xf32>
      tpu.vector_store %arg5[%c0_25, %c0_26, %c0_27], %48 {strides = array<i32>} : memref<1x8x128xf32, #tpu.memory_space<vmem>>, vector<1x8x128xf32>,
      %cst_28 = arith.constant 0.000000e+00 : f32
      %49 = vector.broadcast %cst_28 : f32 to vector<8x128xf32>
      %c0_29 = arith.constant 0 : index
      %c0_30 = arith.constant 0 : index
      %c0_31 = arith.constant 0 : index
      %50 = vector.load %arg6[%c0_29, %c0_30, %c0_31] : memref<1x8x128xf32, #tpu.memory_space<vmem>>, vector<1x8x128xf32>
      %51 = vector.shape_cast %50 : vector<1x8x128xf32> to vector<8x128xf32>
      %52 = vector.shape_cast %49 : vector<8x128xf32> to vector<1x8x128xf32>
      tpu.vector_store %arg6[%c0_29, %c0_30, %c0_31], %52 {strides = array<i32>} : memref<1x8x128xf32, #tpu.memory_space<vmem>>, vector<1x8x128xf32>,
    } else {
    }
    %c0 = arith.constant 0 : index
    %c0_1 = arith.constant 0 : index
    %c0_2 = arith.constant 0 : index
    %c0_3 = arith.constant 0 : index
    %3 = vector.load %arg3[%c0, %c0_1, %c0_2, %c0_3] : memref<1x4x8x128xf32, #tpu.memory_space<vmem>>, vector<1x4x8x128xf32>
    %4 = vector.shape_cast %3 : vector<1x4x8x128xf32> to vector<4x8x128xf32>
    %c0_4 = arith.constant 0 : index
    %c0_5 = arith.constant 0 : index
    %c0_6 = arith.constant 0 : index
    %5 = vector.load %arg4[%c0_4, %c0_5, %c0_6] : memref<1x8x128xi32, #tpu.memory_space<vmem>>, vector<1x8x128xi32>
    %6 = vector.shape_cast %5 : vector<1x8x128xi32> to vector<8x128xi32>
    %cst = arith.constant dense<0xFF800000> : vector<8x128xf32>
    %7 = vector.multi_reduction <maximumf>, %4, %cst [0] : vector<4x8x128xf32> to vector<8x128xf32>
    %8 = vector.shape_cast %7 : vector<8x128xf32> to vector<1x8x128xf32>
    %9 = vector.broadcast %8 : vector<1x8x128xf32> to vector<4x8x128xf32>
    %10 = arith.subf %4, %9 : vector<4x8x128xf32>
    %11 = math.exp %10 : vector<4x8x128xf32>
    %cst_7 = arith.constant dense<0.000000e+00> : vector<8x128xf32>
    %12 = vector.multi_reduction <add>, %11, %cst_7 [0] : vector<4x8x128xf32> to vector<8x128xf32>
    %13 = math.log %12 : vector<8x128xf32>
    %14 = arith.addf %7, %13 : vector<8x128xf32>
    %15 = tpu.iota {dimensions = array<i32: 0>} : vector<4x8x128xi32>
    %16 = vector.shape_cast %6 : vector<8x128xi32> to vector<1x8x128xi32>
    %17 = vector.broadcast %16 : vector<1x8x128xi32> to vector<4x8x128xi32>
    %18 = arith.cmpi eq, %15, %17 : vector<4x8x128xi32>
    %cst_8 = arith.constant 0.000000e+00 : f32
    %19 = vector.broadcast %cst_8 : f32 to vector<4x8x128xf32>
    %20 = arith.select %18, %4, %19 : vector<4x8x128xi1>, vector<4x8x128xf32>
    %cst_9 = arith.constant dense<0.000000e+00> : vector<8x128xf32>
    %21 = vector.multi_reduction <add>, %20, %cst_9 [0] : vector<4x8x128xf32> to vector<8x128xf32>
    %c255_i32 = arith.constant 255 : i32
    %22 = vector.broadcast %c255_i32 : i32 to vector<8x128xi32>
    %23 = arith.cmpi ne, %6, %22 : vector<8x128xi32>
    %24 = arith.subf %14, %21 : vector<8x128xf32>
    %cst_10 = arith.constant 0.000000e+00 : f32
    %25 = vector.broadcast %cst_10 : f32 to vector<8x128xf32>
    %26 = arith.select %23, %24, %25 : vector<8x128xi1>, vector<8x128xf32>
    %cst_11 = arith.constant 0.356674939 : f32
    %27 = vector.broadcast %cst_11 : f32 to vector<8x128xf32>
    %28 = arith.cmpf ogt, %26, %27 : vector<8x128xf32>
    %29 = arith.andi %28, %23 : vector<8x128xi1>
    %30 = arith.extui %29 : vector<8x128xi1> to vector<8x128xi32>
    %31 = arith.sitofp %30 : vector<8x128xi32> to vector<8x128xf32>
    %c0_12 = arith.constant 0 : index
    %c0_13 = arith.constant 0 : index
    %c0_14 = arith.constant 0 : index
    %32 = vector.load %arg5[%c0_12, %c0_13, %c0_14] : memref<1x8x128xf32, #tpu.memory_space<vmem>>, vector<1x8x128xf32>
    %33 = vector.shape_cast %32 : vector<1x8x128xf32> to vector<8x128xf32>
    %34 = arith.mulf %26, %31 : vector<8x128xf32>
    %35 = arith.addf %33, %34 : vector<8x128xf32>
    %c0_15 = arith.constant 0 : index
    %c0_16 = arith.constant 0 : index
    %c0_17 = arith.constant 0 : index
    %36 = vector.load %arg5[%c0_15, %c0_16, %c0_17] : memref<1x8x128xf32, #tpu.memory_space<vmem>>, vector<1x8x128xf32>
    %37 = vector.shape_cast %36 : vector<1x8x128xf32> to vector<8x128xf32>
    %38 = vector.shape_cast %35 : vector<8x128xf32> to vector<1x8x128xf32>
    tpu.vector_store %arg5[%c0_15, %c0_16, %c0_17], %38 {strides = array<i32>} : memref<1x8x128xf32, #tpu.memory_space<vmem>>, vector<1x8x128xf32>,
    %c0_18 = arith.constant 0 : index
    %c0_19 = arith.constant 0 : index
    %c0_20 = arith.constant 0 : index
    %39 = vector.load %arg6[%c0_18, %c0_19, %c0_20] : memref<1x8x128xf32, #tpu.memory_space<vmem>>, vector<1x8x128xf32>
    %40 = vector.shape_cast %39 : vector<1x8x128xf32> to vector<8x128xf32>
    %41 = arith.addf %40, %31 : vector<8x128xf32>
    %c0_21 = arith.constant 0 : index
    %c0_22 = arith.constant 0 : index
    %c0_23 = arith.constant 0 : index
    %42 = vector.load %arg6[%c0_21, %c0_22, %c0_23] : memref<1x8x128xf32, #tpu.memory_space<vmem>>, vector<1x8x128xf32>
    %43 = vector.shape_cast %42 : vector<1x8x128xf32> to vector<8x128xf32>
    %44 = vector.shape_cast %41 : vector<8x128xf32> to vector<1x8x128xf32>
    tpu.vector_store %arg6[%c0_21, %c0_22, %c0_23], %44 {strides = array<i32>} : memref<1x8x128xf32, #tpu.memory_space<vmem>>, vector<1x8x128xf32>,
    return
  }
  func.func @transform_0(%arg0: i32, %arg1: i32, %arg2: i32) -> (i32, i32, i32, i32) {
    %c1_i32 = arith.constant 1 : i32
    %0 = arith.muli %arg1, %c1_i32 : i32
    %1 = arith.addi %0, %arg2 : i32
    %c0_i32 = arith.constant 0 : i32
    %c0_i32_0 = arith.constant 0 : i32
    %c0_i32_1 = arith.constant 0 : i32
    return %arg0, %c0_i32, %1, %c0_i32_0 : i32, i32, i32, i32
  }
  func.func @transform_1(%arg0: i32, %arg1: i32, %arg2: i32) -> (i32, i32, i32) {
    %c1_i32 = arith.constant 1 : i32
    %0 = arith.muli %arg1, %c1_i32 : i32
    %1 = arith.addi %0, %arg2 : i32
    %c0_i32 = arith.constant 0 : i32
    %c0_i32_0 = arith.constant 0 : i32
    return %arg0, %1, %c0_i32 : i32, i32, i32
  }
  func.func @transform_2(%arg0: i32, %arg1: i32, %arg2: i32) -> (i32, i32, i32) {
    %c1_i32 = arith.constant 1 : i32
    %0 = arith.muli %arg0, %c1_i32 : i32
    %1 = arith.addi %0, %arg1 : i32
    %c0_i32 = arith.constant 0 : i32
    %c0_i32_0 = arith.constant 0 : i32
    %c0_i32_1 = arith.constant 0 : i32
    return %1, %c0_i32, %c0_i32_0 : i32, i32, i32
  }
  func.func @transform_3(%arg0: i32, %arg1: i32, %arg2: i32) -> (i32, i32, i32) {
    %c1_i32 = arith.constant 1 : i32
    %0 = arith.muli %arg0, %c1_i32 : i32
    %1 = arith.addi %0, %arg1 : i32
    %c0_i32 = arith.constant 0 : i32
    %c0_i32_0 = arith.constant 0 : i32
    %c0_i32_1 = arith.constant 0 : i32
    return %1, %c0_i32, %c0_i32_0 : i32, i32, i32
  }
}

</mosaic_0001>

<bundles_post_ra>
// kernel: tpu_custom_call.1
= control target key start
LH: loop header
LB: loop body
LE: loop exit
PB: predicated region body
PF: predicated region fallthrough
CT: control target
= control target key end

     0   :  { %9 = vsyncpa [#allocation3], 0  ;;  %s1077_s0 = inlined_call_operand.hbm [shape: f32[2,4,8,128], index: 0, kind: input, shape index: {}]   ;;  %s1078_s1 = inlined_call_operand.hbm [shape: s32[2,8,128], index: 1, kind: input, shape index: {}]   ;;  %s1079_s2 = inlined_call_operand.hbm [shape: f32[2,8,128], index: 2, kind: output, shape index: {0}]   ;;  %s1080_s3 = inlined_call_operand.hbm [shape: f32[2,8,128], index: 3, kind: output, shape index: {1}]  }
   0x1   :  { %11 = vsyncpa [#allocation3 + $0x1], 0 }
   0x2   :  { %12 = vsyncpa [#allocation6], 0 }
   0x3   :  { %14 = vsyncpa [#allocation6 + $0x1], 0 }
   0x4   :  { %15 = vsyncpa [#allocation4], 0 }
   0x5   :  { %17 = vsyncpa [#allocation4 + $0x1], 0 }
   0x6   :  { %18 = vsyncpa [#allocation9], 0 }
   0x7   :  { %20 = vsyncpa [#allocation9 + $0x1], 0  ;;  %s824_s12 = smov 0   ;;  %s826_s13 = smov 0  }
   0x8   :  { %s828_s14 = smov 0   ;;  %s830_s15 = smov 0  }
   0x9   :  { %s832_s16 = smov 0   ;;  %s834_s17 = smov 0  }
   0xa LB: > { %s510_s18 = sadd.s32 4294967295, %s795_s17   ;;  %s511_s19 = sadd.s32 4294967294, %s795_s17   ;;  %s795_s17 = sphi %s834_s17, %s26_s17   ;;  %s791_s16 = sphi %s832_s16, %s1099_s16   ;;  %s787_s15 = sphi %s830_s15, %s1098_s15   ;;  %s783_s14 = sphi %s828_s14, %s1097_s14   ;;  %s779_s13 = sphi %s826_s13, %s1096_s13   ;;  %s775_s12 = sphi %s824_s12, %s1095_s12  }
   0xb   : > { %s45_s20 = sadd.s32 1, %s791_s16  ;;  %s56_s21 = sadd.s32 1, %s783_s14 }
   0xc   : > { %p47_p0 = scmp.ge.s32.totalorder %s45_s20, 2  ;;  %p63_p1 = scmp.ne.s32.totalorder %s783_s14, %s779_s13 }
   0xd   : > { %p64_p2 = scmp.eq.s32.totalorder %s795_s17, 0  ;;  %p69_p3 = scmp.ne.s32.totalorder %s779_s13, %s775_s12 }
   0xe   : > { %s1101_s20 = smov (%p47_p0, %s45_s20), 0  ;;  %p70_p5 = scmp.eq.s32.totalorder %s510_s18, 0 }
   0xf   : > { %p865_p4 = por %p64_p2, %p63_p1  ;;  %s51_s23 = ssub.s32 %s791_s16, %s1101_s20 }
  0x10   : > { %p125_p6 = scmp.eq.s32.totalorder %s510_s18, 1  ;;  %p54_p7 = scmp.eq.s32.totalorder %s51_s23, 0 }
  0x11   : > { %p871_p8 = por %p70_p5, %p69_p3  ;;  %p131_p10 = scmp.eq.s32.totalorder %s511_s19, 1 }
  0x12   : > { %p875_p9 = por %p125_p6, %p63_p1  ;;  %p554_p13 = scmp.lt.s32.totalorder %s795_s17, 2 }
  0x13   : > { %s1084_s24 = scalar_select %p871_p8, 1, 0 }
  0x14   : > { %s1085_s25 = scalar_select %p875_p9, 1, 0 }
  0x15   : > { %s880_s26 = scalar_select %p54_p7, %s783_s14, %s56_s21  }
  0x16   : > { %p882_p11 = por %p131_p10, %p69_p3  ;;  %s889_s28 = sand.u32 1, %s783_s14  }
  0x17   : > { %s514_s29 = sshll.u32 %s889_s28, 5  ;;  %s531_s30 = sshll.u32 %s791_s16, 9 }
  0x18   : > { %s1086_s27 = scalar_select %p882_p11, 1, 0 }
  0x19   : > { %s896_s6 = scalar_lea.hbm %s1077_s0, %s531_s30  ;;  %s183_s7 = scalar_lea.vmem [#allocation2], %s514_s29 }
  0x1a   : > { %s192_s8 = sshll.u32 %s183_s7, 4  ;;  %p902_p0 = pnand %p554_p13, %p865_p4  ;;  %s898_s8 = int_to_ptr.vmem [resolvable:$true] %s192_s8 }
  0x1b   : > { %s180_s10 = scalar_lea.sflag [#allocation3], %s889_s28  ;;  %s617_s11 = scalar_lea.hbm %s896_s6, 512 }
  0x1c   : > { %p618_p2 = scmp.ne.s32.totalorder %s896_s6, %s617_s11  ;;  %p619_p3 = pneg %p902_p0 }
  0x1d   : > { %s622_s21 = scalar_lea.hbm %s1077_s0, 1024  ;;  %p623_p4 = scmp.lt.u32.totalorder %s896_s6, %s1077_s0 }
  0x1e   : > { %p620_p5 = pnand %p619_p3, %p618_p2  ;;  %p624_p7 = scmp.lt.u32.totalorder %s622_s21, %s617_s11 }
  0x1f   : > { %p626_p13 = scmp.lt.u32.totalorder %s617_s11, %s896_s6 }
  0x20   : > { %p621_p6 = pneg %p620_p5  ;;  %p625_p10 = por %p624_p7, %p623_p4 }
  0x22   : > { %p627_p12 = por %p626_p13, %p625_p10 }
  0x24   : > { %p628_p1 = pnand %p627_p12, %p621_p6 }
  0x26   : > { %631 = shalt.err (!%p628_p1)
}
  0x27   : > { %s632_s29 = scalar_lea.vmem %s898_s8, 512  ;;  %s797_s30 = smov [#allocation2]  }
  0x28   : > { %p633_p2 = scmp.ne.s32.totalorder %s898_s8, %s632_s29  ;;  %s637_s4 = sshll.u32 %s797_s30, 4  ;;  %s638_s4 = int_to_ptr.vmem [resolvable:$false] %s637_s4 }
  0x29   : > { %s639_s5 = scalar_lea.vmem %s638_s4, 1024  ;;  %p640_p9 = scmp.lt.s32.totalorder %s898_s8, %s638_s4 }
  0x2a   : > { %p635_p5 = pnand %p633_p2, %p619_p3  ;;  %p641_p4 = scmp.lt.s32.totalorder %s639_s5, %s632_s29 }
  0x2c   : > { %p636_p11 = pneg %p635_p5  ;;  %p642_p7 = por %p641_p4, %p640_p9 }
  0x2e   : > { %p643_p10 = pnand %p642_p7, %p636_p11 }
  0x30   : > { %646 = shalt.err (!%p643_p10)
}
  0x31   : > { %s798_s7 = smov 128   ;;  %s799_s11 = smov 8  }
  0x32   : > { %543 = dma.hbm_to_vmem [thread:$0]  (!%p902_p0), %s896_s6, 512, %s898_s8, %s180_s10, %s798_s7, %s798_s7, %s799_s11  }
  0x33   : > { %p220_p12 = scmp.lt.s32.totalorder %s795_s17, 3  ;;  %s517_s18 = sshll.u32 %s889_s28, 3 }
  0x34   : > { %s518_s19 = sshll.u32 %s791_s16, 7  ;;  %p1088_p9 = scmp.ge.s32.totalorder %s795_s17, 1 }
  0x35   : > { %s947_s29 = scalar_lea.hbm %s1078_s1, %s518_s19  ;;  %s206_s30 = scalar_lea.vmem [#allocation5], %s517_s18 }
  0x36   : > { %p940_p11 = pnand %p1088_p9, %p220_p12  ;;  %s215_s4 = sshll.u32 %s206_s30, 4  ;;  %s216_s4 = int_to_ptr.vmem [resolvable:$true] %s215_s4 }
  0x37   : > { %s203_s6 = scalar_lea.sflag [#allocation6], %s889_s28  ;;  %s647_s8 = scalar_lea.hbm %s947_s29, 128 }
  0x38   : > { %s1089_s21 = scalar_select %p940_p11, 1, 0 }
  0x39   : > { %p648_p1 = scmp.ne.s32.totalorder %s947_s29, %s647_s8  ;;  %s652_s7 = scalar_lea.hbm %s1078_s1, 256 }
  0x3a   : > { %p653_p2 = scmp.lt.u32.totalorder %s947_s29, %s1078_s1  ;;  %p654_p5 = scmp.lt.u32.totalorder %s652_s7, %s647_s8 }
  0x3b   : > { %p650_p6 = pnand %p648_p1, %p619_p3  ;;  %p656_p7 = scmp.lt.u32.totalorder %s647_s8, %s947_s29 }
  0x3c   : > { %p655_p4 = por %p654_p5, %p653_p2 }
  0x3d   : > { %p651_p13 = pneg %p650_p6 }
  0x3e   : > { %p657_p10 = por %p656_p7, %p655_p4 }
  0x40   : > { %p658_p12 = pnand %p657_p10, %p651_p13 }
  0x42   : > { %661 = shalt.err (!%p658_p12)
}
  0x43   : > { %s662_s28 = scalar_lea.vmem %s216_s4, 128  ;;  %s800_s18 = smov [#allocation5]  }
  0x44   : > { %p663_p9 = scmp.ne.s32.totalorder %s216_s4, %s662_s28  ;;  %s667_s22 = sshll.u32 %s800_s18, 4  ;;  %s668_s22 = int_to_ptr.vmem [resolvable:$false] %s667_s22 }
  0x45   : > { %s669_s23 = scalar_lea.vmem %s668_s22, 256  ;;  %p670_p8 = scmp.lt.s32.totalorder %s216_s4, %s668_s22 }
  0x46   : > { %p665_p1 = pnand %p663_p9, %p619_p3  ;;  %p671_p11 = scmp.lt.s32.totalorder %s669_s23, %s662_s28 }
  0x48   : > { %p666_p6 = pneg %p665_p1  ;;  %p672_p2 = por %p671_p11, %p670_p8 }
  0x4a   : > { %p673_p5 = pnand %p672_p2, %p666_p6 }
  0x4c   : > { %676 = shalt.err (!%p673_p5)
}
  0x4d   : > { %546 = dma.hbm_to_vmem [thread:$0]  (!%p902_p0), %s947_s29, 128, %s216_s4, %s203_s6  }
  0x4e   : > { %p1090_p13 = scmp.ne.s32.totalorder %s1089_s21, 0 }
  0x4f   : > { %s972_s30 = sand.u32 (!%p1090_p13), 1, %s779_s13   ;;  %p1091_p3 = scmp.ne.s32.totalorder (!%p1090_p13), %s1084_s24, 0 }
  0x50   : > { %224 = sbr.rel (%p1090_p13) target bundleno = 177 (0xb1), region = 28  ;;  %s520_s8 = sshll.u32 (!%p1090_p13), %s972_s30, 5 }
  0x51   : > { %s227_s10 = scalar_lea.sflag (!%p1090_p13), [#allocation3], %s972_s30  ;;  %s230_s5 = scalar_lea.vmem (!%p1090_p13), [#allocation2], %s520_s8 }
  0x57   : > { %758 = dma.done.wait (%p1091_p3), %s227_s10, 512  }
  0x58   : > { %760 = vsyncadd (%p1091_p3), %s227_s10, 4294966784  ;;  %s981_s9 = sshll.u32 %s972_s30, 3  ;;  %s236_s21 = scalar_lea.sflag [#allocation6], %s972_s30 }
  0x59   : > { %s239_s29 = scalar_lea.vmem [#allocation5], %s981_s9 }
  0x5a   : > { %762 = dma.done.wait (%p1091_p3), %s236_s21, 128  }
  0x5b   : > { %764 = vsyncadd (%p1091_p3), %s236_s21, 4294967168  ;;  %v282_v0 = vld [vmem:[%s230_s5] sm:$0xff]  ;;  %v283_v1 = vld [vmem:[%s230_s5 + $0x8] sm:$0xff]  ;;  %s527_s24 = sshll.u32 %s787_s15, 7  ;;  %s271_s4 = scalar_lea.vmem [#allocation8], %s981_s9  ;;  %v801_v35 = vmov 0.0  }
  0x5c   : > { %v284_v2 = vld [vmem:[%s230_s5 + $0x10] sm:$0xff]  ;;  %v285_v3 = vld [vmem:[%s230_s5 + $0x18] sm:$0xff]  ;;  %v287_v4 = vmax.f32 %v282_v0, %v283_v1  ;;  %v286_v18 = vld [vmem:[%s239_s29] sm:$0xff]  ;;  %s367_s6 = sshll.u32 %s271_s4, 4  ;;  %s264_s7 = scalar_lea.vmem [#allocation7], %s981_s9  ;;  %s999_s6 = int_to_ptr.vmem [resolvable:$true] %s367_s6 }
  0x5d   : > { %v288_v5 = vmax.f32 %v284_v2, %v285_v3  ;;  %vm308_vm0 = vcmp.eq.s32.totalorder %v286_v18, 0  ;;  %vm309_vm1 = vcmp.eq.s32.totalorder %v286_v18, 1  ;;  %vm310_vm2 = vcmp.eq.s32.totalorder %v286_v18, 2  ;;  %s353_s11 = sshll.u32 %s264_s7, 4  ;;  %s997_s18 = scalar_lea.hbm %s1080_s3, %s527_s24  ;;  %s1006_s11 = int_to_ptr.vmem [resolvable:$true] %s353_s11 }
  0x5e   : > { %v312_v23 = vsel %vm308_vm0, %v282_v0, 0.0  ;;  %v313_v24 = vsel %vm309_vm1, %v283_v1, 0.0  ;;  %v314_v26 = vsel %vm310_vm2, %v284_v2, 0.0  ;;  %vm311_vm3 = vcmp.eq.s32.totalorder %v286_v18, 3  ;;  %s1004_s23 = scalar_lea.hbm %s1079_s2, %s527_s24  ;;  %s339_s8 = scalar_lea.sflag [#allocation9], %s972_s30 }
  0x5f   : > { %v289_v6 = vmax.f32 %v287_v4, %v288_v5  ;;  %v316_v25 = vadd.f32 %v313_v24, %v312_v23  ;;  %v315_v28 = vsel %vm311_vm3, %v285_v3, 0.0  ;;  %vm319_vm4 = vcmp.ne.s32.totalorder %v286_v18, 255  ;;  %s677_s10 = scalar_lea.vmem %s999_s6, 128  ;;  %p1092_p0 = scmp.ne.s32.totalorder %s1085_s25, 0 }
  0x60   : > { %p678_p8 = scmp.ne.s32.totalorder %s999_s6, %s677_s10  ;;  %s802_s5 = smov [#allocation8]  }
  0x61   : > { %v290_v7 = vsub.f32 %v282_v0, %v289_v6  ;;  %v291_v8 = vsub.f32 %v283_v1, %v289_v6  ;;  %v292_v9 = vsub.f32 %v284_v2, %v289_v6  ;;  %v293_v10 = vsub.f32 %v285_v3, %v289_v6  ;;  %s681_s21 = sshll.u32 %s802_s5, 4  ;;  %s682_s21 = int_to_ptr.vmem [resolvable:$false] %s681_s21 }
  0x62   : > { %v317_v27 = vadd.f32 %v316_v25, %v314_v26  ;;  %p679_p11 = pnand %p678_p8, %p1092_p0  ;;  %s683_s29 = scalar_lea.vmem %s682_s21, 256 }
  0x63   : > { %v294_v11 = vmul.f32 1.442695, %v290_v7  ;;  %v296_v12 = vmul.f32 1.442695, %v291_v8  ;;  %v298_v13 = vmul.f32 1.442695, %v292_v9  ;;  %p684_p7 = scmp.lt.s32.totalorder %s999_s6, %s682_s21  ;;  %p685_p10 = scmp.lt.s32.totalorder %s683_s29, %s677_s10 }
  0x64   : > { %v300_v14 = vmul.f32 1.442695, %v293_v10  ;;  %v318_v31 = vadd.f32 %v317_v27, %v315_v28  ;;  %p680_p4 = pneg %p679_p11 }
  0x65   : > { %607 = vpow2.f32 %v294_v11  ;;  %p686_p12 = por %p685_p10, %p684_p7 }
  0x66   : > { %609 = vpow2.f32 %v296_v12 }
  0x67   : > { %611 = vpow2.f32 %v298_v13  ;;  %p687_p9 = pnand %p686_p12, %p680_p4 }
  0x68   : > { %613 = vpow2.f32 %v300_v14 }
  0x6f   : > { %v608_v15 = vpop.eup %607 }
  0x70   : > { %v610_v16 = vpop.eup %609 }
  0x71   : > { %v612_v17 = vpop.eup %611  ;;  %v302_v19 = vadd.f32 %v610_v16, %v608_v15 }
  0x72   : > { %v614_v20 = vpop.eup %613 }
  0x73   : > { %v303_v21 = vadd.f32 %v612_v17, %v302_v19 }
  0x75   : > { %v304_v22 = vadd.f32 %v614_v20, %v303_v21 }
  0x77   : > { %615 = vlog2.f32 %v304_v22 }
  0x81   : > { %v616_v29 = vpop.eup %615 }
  0x82   : > { %v306_v30 = vmul.f32 0.6931472, %v616_v29 }
  0x84   : > { %v307_v32 = vadd.f32 %v306_v30, %v289_v6 }
  0x86   : > { %v320_v33 = vsub.f32 %v307_v32, %v318_v31 }
  0x88   : > { %v321_v34 = vsel %vm319_vm4, %v320_v33, 0.0 }
  0x89   : > { %vm322_vm5 = vcmp.gt.f32.partialorder %v321_v34, 0.35667494 }
  0x8a   : > { %vm323_vm6 = vmand %vm322_vm5, %vm319_vm4 }
  0x8b   : > { %v524_v36 = vsel %vm323_vm6, 1.0, %v801_v35 }
  0x8c   : > { %v327_v37 = vmul.f32 %v524_v36, %v321_v34  ;;  %332 = vst [vmem:[%s271_s4] sm:$0xff] %v524_v36 }
  0x8d   : > { %690 = shalt.err (!%p687_p9)
}
  0x8e   : > { %s691_s24 = scalar_lea.hbm %s997_s18, 128  ;;  %s695_s28 = scalar_lea.hbm %s1080_s3, 256 }
  0x8f   : > { %p692_p1 = scmp.ne.s32.totalorder %s997_s18, %s691_s24  ;;  %p696_p5 = scmp.lt.u32.totalorder %s997_s18, %s1080_s3 }
  0x90   : > { %p697_p13 = scmp.lt.u32.totalorder %s695_s28, %s691_s24  ;;  %p699_p8 = scmp.lt.u32.totalorder %s691_s24, %s997_s18 }
  0x91   : > { %p693_p6 = pnand %p692_p1, %p1092_p0 }
  0x92   : > { %p698_p3 = por %p697_p13, %p696_p5 }
  0x93   : > { %p694_p2 = pneg %p693_p6 }
  0x94   : > { %p700_p11 = por %p699_p8, %p698_p3 }
  0x96   : > { %p701_p4 = pnand %p700_p11, %p694_p2 }
  0x98   : > { %704 = shalt.err (!%p701_p4)
}
  0x99   : > { %537 = dma.vmem_to_hbm [thread:$0]  (%p1092_p0), %s999_s6, 128, %s997_s18, %s339_s8   ;;  %329 = vst [vmem:[%s264_s7] sm:$0xff] %v327_v37 }
  0x9a   : > { %s334_s10 = scalar_lea.sflag [#allocation4], %s972_s30  ;;  %s705_s5 = scalar_lea.vmem %s1006_s11, 128 }
  0x9b   : > { %p706_p7 = scmp.ne.s32.totalorder %s1006_s11, %s705_s5  ;;  %s803_s21 = smov [#allocation7]  }
  0x9c   : > { %s709_s29 = sshll.u32 %s803_s21, 4  ;;  %s710_s29 = int_to_ptr.vmem [resolvable:$false] %s709_s29 }
  0x9d   : > { %p707_p10 = pnand %p706_p7, %p1092_p0  ;;  %s711_s24 = scalar_lea.vmem %s710_s29, 256 }
  0x9e   : > { %p712_p9 = scmp.lt.s32.totalorder %s1006_s11, %s710_s29  ;;  %p713_p1 = scmp.lt.s32.totalorder %s711_s24, %s705_s5 }
  0x9f   : > { %p708_p12 = pneg %p707_p10 }
  0xa0   : > { %p714_p6 = por %p713_p1, %p712_p9 }
  0xa2   : > { %p715_p2 = pnand %p714_p6, %p708_p12 }
  0xa4   : > { %718 = shalt.err (!%p715_p2)
}
  0xa5   : > { %s719_s30 = scalar_lea.hbm %s1004_s23, 128  ;;  %s723_s7 = scalar_lea.hbm %s1079_s2, 256 }
  0xa6   : > { %p720_p5 = scmp.ne.s32.totalorder %s1004_s23, %s719_s30  ;;  %p724_p8 = scmp.lt.u32.totalorder %s1004_s23, %s1079_s2 }
  0xa7   : > { %p725_p11 = scmp.lt.u32.totalorder %s723_s7, %s719_s30  ;;  %p727_p7 = scmp.lt.u32.totalorder %s719_s30, %s1004_s23 }
  0xa8   : > { %p721_p13 = pnand %p720_p5, %p1092_p0 }
  0xa9   : > { %p726_p4 = por %p725_p11, %p724_p8 }
  0xaa   : > { %p722_p3 = pneg %p721_p13 }
  0xab   : > { %p728_p10 = por %p727_p7, %p726_p4 }
  0xad   : > { %p729_p12 = pnand %p728_p10, %p722_p3 }
  0xaf   : > { %732 = shalt.err (!%p729_p12)
}
  0xb0   : > { %536 = dma.vmem_to_hbm [thread:$0]  (%p1092_p0), %s1006_s11, 128, %s1004_s23, %s334_s10  }
  0xb1 PF: > { %s379_s4 = sand.u32 1, %s775_s12   ;;  %p1093_p9 = scmp.ne.s32.totalorder %s1086_s27, 0 }
  0xb2   : > { %p1094_p1 = scmp.ge.s32.totalorder %s795_s17, 2  ;;  %s380_s19 = scalar_lea.sflag [#allocation4], %s379_s4 }
  0xb4   : > { %p548_p6 = pnand %p1094_p1, %p1093_p9 }
  0xb6   : > { %766 = dma.done.wait (!%p548_p6), %s380_s19, 128  }
  0xb7   : > { %768 = vsyncadd (!%p548_p6), %s380_s19, 4294967168  ;;  %s389_s28 = scalar_lea.sflag [#allocation9], %s379_s4 }
  0xb8   : > { %770 = dma.done.wait (!%p548_p6), %s389_s28, 128  }
  0xb9   : > { %772 = vsyncadd (!%p548_p6), %s389_s28, 4294967168  ;;  %s26_s17 = sadd.s32 1, %s795_s17   ;;  %s1095_s12 = smov %s779_s13 }
  0xba   : > { %p23_p2 = scmp.ge.s32.totalorder %s26_s17, 4   ;;  %s1096_s13 = smov %s783_s14 }
  0xbb   : > { %s1097_s14 = smov %s880_s26  ;;  %s1098_s15 = smov %s791_s16 }
  0xbc   : > { %s1099_s16 = smov %s1101_s20  ;;  %25 = sbr.rel (!%p23_p2) target bundleno = 10 (0xa), region = 107 }
  0xc3   :  { %394 = vsyncpa [#allocation3], 1 }
  0xc4   :  { %396 = vsyncpa [#allocation3 + $0x1], 1 }
  0xc5   :  { %397 = vsyncpa [#allocation6], 1 }
  0xc6   :  { %399 = vsyncpa [#allocation6 + $0x1], 1 }
  0xc7   :  { %400 = vsyncpa [#allocation4], 1 }
  0xc8   :  { %402 = vsyncpa [#allocation4 + $0x1], 1 }
  0xc9   :  { %403 = vsyncpa [#allocation9], 1 }
  0xca   :  { %405 = vsyncpa [#allocation9 + $0x1], 1 }

</bundles_post_ra>
